<compile_context>
chip_gen: v7x
topology: tpu7x:2x2x1
jax: 0.10.0
libtpu: 0.0.40
codegen_flags: <defaults>
</compile_context>

<pallas_src>
import functools

import jax
import jax.numpy as jnp
from jax.experimental import pallas as pl
from jax.experimental.pallas import tpu as pltpu


def _round_up(x, m):
    return (x + m - 1) // m * m


def _pad_to(a, axis, size):
    pad = size - a.shape[axis]
    if pad <= 0:
        return a
    widths = [(0, 0)] * a.ndim
    widths[axis] = (0, pad)
    return jnp.pad(a, widths)


def _location_cnn_kernel(n_img, hw, eps,
                         idx_ref,                       # scalar prefetch (head index)
                         patches_ref, wconv_ref, gamma_ref, beta_ref,
                         wlin_ref, blin_ref, selw_ref,
                         o_ref,
                         pool_ref, sumsq_ref):
    del idx_ref                                          # used only by the index_maps
    n = pl.program_id(0)                                 # image index
    t = pl.program_id(1)                                 # spatial tile index

    @pl.when((n == 0) & (t == 0))
    def _init():
        pool_ref[...] = jnp.zeros_like(pool_ref)
        sumsq_ref[...] = jnp.zeros_like(sumsq_ref)

    # ---- stem: Conv2d(C_in, 3*C, k=3, s=1, p=1, bias=False) as im2col matmul ----
    # bf16 operands, f32 accumulation on the MXU.
    y = jnp.dot(patches_ref[...], wconv_ref[...],
                preferred_element_type=jnp.float32)      # (TILE_HW, C_PAD)

    # ---- single-pass BN statistics + per-image pooled raw sums ------------------
    s = jnp.sum(y, axis=0, keepdims=True)                # (1, C_PAD)
    sumsq_ref[...] += jnp.sum(y * y, axis=0, keepdims=True)
    img = jax.lax.broadcasted_iota(jnp.int32, (n_img, 1), 0)
    pool_ref[...] += (img == n).astype(jnp.float32) * s  # masked per-image accumulate

    # ---- finalize on the last grid point ----------------------------------------
    @pl.when((n == pl.num_programs(0) - 1) & (t == pl.num_programs(1) - 1))
    def _finalize():
        total = float(n_img * hw)
        pooled_sum = pool_ref[...]                                    # (N, C_PAD)
        mean = jnp.sum(pooled_sum, axis=0, keepdims=True) / total
        var = jnp.maximum(sumsq_ref[...] / total - mean * mean, 0.0)  # biased (train)
        scale = jax.lax.rsqrt(var + eps) * gamma_ref[...]
        # AdaptiveAvgPool2d(1) commutes with the per-channel BN affine:
        #   mean_hw(BN(y)) == BN_affine(mean_hw(y)).
        # TODO(synk): AugmentCell chain (genotype-defined DARTS cells) is not
        #             defined in the provided source; treated as identity here.
        pooled = pooled_sum * (1.0 / float(hw))                       # (N, C_PAD)
        h = (pooled - mean) * scale + beta_ref[...]
        # selected Linear head (only this head's weights were DMA'd into VMEM)
        logits = jnp.dot(h, wlin_ref[...],
                         preferred_element_type=jnp.float32) + blin_ref[...]
        o_ref[...] = (selw_ref[0] * logits).astype(o_ref.dtype)


def _im2col_3x3(x_nhwc):
    """(N,H,W,C) -> (N, H*W, 9*C) patches for a 3x3 / stride 1 / pad 1 conv."""
    N, H, W, C = x_nhwc.shape
    xp = jnp.pad(x_nhwc, ((0, 0), (1, 1), (1, 1), (0, 0)))
    taps = [xp[:, kh:kh + H, kw:kw + W, :] for kh in range(3) for kw in range(3)]
    # TODO(synk): for large inputs replace the 9x im2col expansion (9x HBM traffic)
    #             with 9 shifted-view accumulated matmuls inside the kernel.
    return jnp.stack(taps, axis=3).reshape(N, H * W, 9 * C)   # tap-major, channel-minor


def gumbel_one_hot(beta, tau, key):
    """Mirror of get_gumble_prob (forward semantics).  Selection glue, plain JAX."""
    # TODO(synk): the PyTorch retry-on-inf/nan while-loop is host-side control flow
    #             on a degenerate sample; omitted (probability ~0 in float32).
    expo = jax.random.exponential(key, beta.shape, dtype=beta.dtype)
    gumbels = -jnp.log(expo)
    logits = (jax.nn.log_softmax(beta, axis=1) + gumbels) / tau
    probs = jax.nn.softmax(logits, axis=1)
    index = jnp.argmax(probs, axis=-1)
    one_h = jax.nn.one_hot(index, beta.shape[1], dtype=probs.dtype)
    hardwts = one_h - jax.lax.stop_gradient(probs) + probs     # forward value == one_h
    return hardwts[0], index[0]


def _pick_spatial_tile(hw, target=512):
    """Largest spatial tile <= target that divides H*W (multiple of 8 if tiled)."""
    if hw <= target:
        return hw
    for cand in range(target, 7, -1):
        if hw % cand == 0 and cand % 8 == 0:
            return cand
    return hw


def location_cnn_forward(x_nchw, params, hardwts, index, *, mxu_dtype=jnp.bfloat16):
    """Full forward: stem -> (cells: identity) -> pool -> selected head -> weighted sum."""
    N, C_in, H, W = x_nchw.shape
    HW = H * W
    C_stem = params["wconv"].shape[1]
    K, _, n_classes = params["wlin"].shape

    C_PAD = _round_up(C_stem, 128)
    CLS_PAD = _round_up(n_classes, 128)
    TILE_HW = _pick_spatial_tile(HW)
    n_tiles = HW // TILE_HW
    patch_dim = 9 * C_in

    x_nhwc = jnp.transpose(x_nchw, (0, 2, 3, 1)).astype(jnp.float32)
    patches = _im2col_3x3(x_nhwc).astype(mxu_dtype)            # (N, HW, 9*C_in)

    # Lane-dense (pad to 128) channel / class dims; zero padding keeps BN stats and
    # head logits exact on the real channels, padded output columns are sliced off.
    wconv = _pad_to(params["wconv"], 1, C_PAD).astype(mxu_dtype)     # (9*C_in, C_PAD)
    gamma = _pad_to(params["bn_gamma"], 1, C_PAD)                    # (1, C_PAD)
    betab = _pad_to(params["bn_beta"], 1, C_PAD)                     # (1, C_PAD)
    wlin = _pad_to(_pad_to(params["wlin"], 1, C_PAD), 2, CLS_PAD)    # (K, C_PAD, CLS_PAD)
    blin = _pad_to(params["blin"], 2, CLS_PAD)                       # (K, 1, CLS_PAD)

    idx = jnp.asarray(index, jnp.int32).reshape((1,))                # scalar prefetch
    selw = hardwts[index].astype(jnp.float32).reshape((1,))          # forward value == 1.0

    kernel = functools.partial(_location_cnn_kernel, N, HW, 1e-5)

    grid_spec = pltpu.PrefetchScalarGridSpec(
        num_scalar_prefetch=1,
        grid=(N, n_tiles),
        in_specs=[
            # im2col patches: one (TILE_HW, 9*C_in) tile per grid step
            pl.BlockSpec((None, TILE_HW, patch_dim), lambda n, t, idx: (n, t, 0)),
            # stem conv weight + BN affine params: resident (constant block index)
            pl.BlockSpec((patch_dim, C_PAD), lambda n, t, idx: (0, 0)),
            pl.BlockSpec((1, C_PAD), lambda n, t, idx: (0, 0)),
            pl.BlockSpec((1, C_PAD), lambda n, t, idx: (0, 0)),
            # only the gumbel-selected head's weights / bias are DMA'd
            pl.BlockSpec((None, C_PAD, CLS_PAD), lambda n, t, idx: (idx[0], 0, 0)),
            pl.BlockSpec((None, 1, CLS_PAD), lambda n, t, idx: (idx[0], 0, 0)),
            # one-hot selection weight (scalar) in SMEM
            pl.BlockSpec(memory_space=pltpu.MemorySpace.SMEM),
        ],
        out_specs=pl.BlockSpec((N, CLS_PAD), lambda n, t, idx: (0, 0)),
        scratch_shapes=[
            pltpu.VMEM((N, C_PAD), jnp.float32),    # per-image pooled raw sums
            pltpu.VMEM((1, C_PAD), jnp.float32),    # global sum of y^2 (BN variance)
        ],
    )

    flops = 2 * N * HW * patch_dim * C_PAD + 2 * N * C_PAD * CLS_PAD
    bytes_accessed = (patches.size * patches.dtype.itemsize
                      + wconv.size * wconv.dtype.itemsize
                      + C_PAD * CLS_PAD * 4 + CLS_PAD * 4
                      + 2 * C_PAD * 4 + N * CLS_PAD * 4)

    out = pl.pallas_call(
        kernel,
        out_shape=jax.ShapeDtypeStruct((N, CLS_PAD), jnp.float32),
        grid_spec=grid_spec,
        compiler_params=pltpu.CompilerParams(
            # BN batch stats and pooled sums are shared accumulators across both
            # grid axes, so both axes are reduction ("arbitrary") axes.
            dimension_semantics=("arbitrary", "arbitrary")),
        cost_estimate=pl.CostEstimate(flops=flops, transcendentals=0,
                                      bytes_accessed=bytes_accessed),
    )(idx, patches, wconv, gamma, betab, wlin, blin, selw)

    return out[:, :n_classes]


def init_params(key, *, C_in, C, n_classes, n_layers, stem_multiplier=3):
    """Deterministic synthetic parameter init (shapes follow LocationCNN.__init__)."""
    reduce_pair_list = []
    for i in range(2 * n_layers // 3 + 1):
        for j in range(i):
            reduce_pair_list.append((j, i))
    K = len(reduce_pair_list)

    C_stem = C * stem_multiplier
    k1, k2, k3, k4 = jax.random.split(key, 4)
    params = {
        # conv weight stored as (kh*3+kw)*C_in + c_in  x  C_out  (matches im2col order)
        "wconv": 0.1 * jax.random.normal(k1, (9 * C_in, C_stem), jnp.float32),
        "bn_gamma": jnp.ones((1, C_stem), jnp.float32),        # BatchNorm2d default init
        "bn_beta": jnp.zeros((1, C_stem), jnp.float32),
        # one Linear head per sub-skeleton (cells are identity => in_features = C_stem)
        "wlin": 0.1 * jax.random.normal(k2, (K, C_stem, n_classes), jnp.float32),
        "blin": 0.01 * jax.random.normal(k3, (K, 1, n_classes), jnp.float32),
        # architecture parameter beta = 0.001 * randn(1, K)
        "beta": 0.001 * jax.random.normal(k4, (1, K), jnp.float32),
    }
    return params, K


if __name__ == "__main__":
    # Small shapes consistent with the module: batch=2, C_in=4, 16x16 input,
    # C=8 (stem -> 24 channels), n_classes=10, n_layers=3 -> K=3 locations.
    N, C_in, H, W = 2, 4, 16, 16
    C, n_classes, n_layers = 8, 10, 3
    tau = 10.0

    root = jax.random.PRNGKey(0)
    k_param, k_x, k_gumbel = jax.random.split(root, 3)

    params, K = init_params(k_param, C_in=C_in, C=C,
                            n_classes=n_classes, n_layers=n_layers)
    x = jax.random.normal(k_x, (N, C_in, H, W), jnp.float32)

    # config.subsampling == 0 path: only the argmax location contributes; the
    # non-selected one-hot forward weights are exactly 0, so evaluating only the
    # selected head reproduces weighted_logit_sum exactly.
    hardwts, index = gumbel_one_hot(params["beta"], tau, k_gumbel)

    out = location_cnn_forward(x, params, hardwts, index)
    out = jax.block_until_ready(out)
    assert out.shape == (N, n_classes), out.shape
    assert bool(jnp.all(jnp.isfinite(out)))
    print("KERNEL_OK")
</pallas_src>

<mosaic_0001>
module attributes {stable_mosaic.version = 11 : i64} {
  func.func @_location_cnn_kernel(%arg0: i32, %arg1: i32, %arg2: memref<1xi32, #tpu.memory_space<smem>>, %arg3: memref<1x256x36xbf16, #tpu.memory_space<vmem>>, %arg4: memref<36x128xbf16, #tpu.memory_space<vmem>>, %arg5: memref<1x128xf32, #tpu.memory_space<vmem>>, %arg6: memref<1x128xf32, #tpu.memory_space<vmem>>, %arg7: memref<1x128x128xf32, #tpu.memory_space<vmem>>, %arg8: memref<1x1x128xf32, #tpu.memory_space<vmem>>, %arg9: memref<1xf32, #tpu.memory_space<smem>>, %arg10: memref<2x128xf32, #tpu.memory_space<vmem>>, %arg11: memref<2x128xf32, #tpu.memory_space<vmem>>, %arg12: memref<1x128xf32, #tpu.memory_space<vmem>>) attributes {dimension_semantics = [#tpu.dimension_semantics<arbitrary>, #tpu.dimension_semantics<arbitrary>], iteration_bounds = array<i64: 2, 1>, scalar_prefetch = 1 : i64, scratch_operands = 2 : i64, tpu.core_type = #tpu.core_type<tc>, window_params = [{transform_indices = @transform_0, window_bounds = array<i64: 1, 256, 36>}, {pipeline_mode = #tpu.pipeline_mode<synchronous>, transform_indices = @transform_1, window_bounds = array<i64: 36, 128>}, {pipeline_mode = #tpu.pipeline_mode<synchronous>, transform_indices = @transform_2, window_bounds = array<i64: 1, 128>}, {pipeline_mode = #tpu.pipeline_mode<synchronous>, transform_indices = @transform_3, window_bounds = array<i64: 1, 128>}, {transform_indices = @transform_4, window_bounds = array<i64: 1, 128, 128>}, {transform_indices = @transform_5, window_bounds = array<i64: 1, 1, 128>}, {transform_indices = @transform_6, window_bounds = array<i64: 1>}, {pipeline_mode = #tpu.pipeline_mode<synchronous>, transform_indices = @transform_7, window_bounds = array<i64: 2, 128>}]} {
    %c0_i32 = arith.constant 0 : i32
    %0 = arith.cmpi eq, %arg0, %c0_i32 : i32
    %c0_i32_0 = arith.constant 0 : i32
    %1 = arith.cmpi eq, %arg1, %c0_i32_0 : i32
    %2 = arith.andi %0, %1 : i1
    %3 = arith.extui %2 : i1 to i32
    %c0_i32_1 = arith.constant 0 : i32
    %4 = arith.cmpi ne, %3, %c0_i32_1 : i32
    scf.if %4 {
      %cst_18 = arith.constant 0.000000e+00 : f32
      %33 = vector.broadcast %cst_18 : f32 to vector<2x128xf32>
      %c0_19 = arith.constant 0 : index
      %c0_20 = arith.constant 0 : index
      %34 = vector.load %arg11[%c0_19, %c0_20] : memref<2x128xf32, #tpu.memory_space<vmem>>, vector<2x128xf32>
      tpu.vector_store %arg11[%c0_19, %c0_20], %33 {strides = array<i32>} : memref<2x128xf32, #tpu.memory_space<vmem>>, vector<2x128xf32>,
      %cst_21 = arith.constant 0.000000e+00 : f32
      %35 = vector.broadcast %cst_21 : f32 to vector<1x128xf32>
      %c0_22 = arith.constant 0 : index
      %c0_23 = arith.constant 0 : index
      %36 = vector.load %arg12[%c0_22, %c0_23] : memref<1x128xf32, #tpu.memory_space<vmem>>, vector<1x128xf32>
      tpu.vector_store %arg12[%c0_22, %c0_23], %35 {strides = array<i32>} : memref<1x128xf32, #tpu.memory_space<vmem>>, vector<1x128xf32>,
    } else {
    }
    %c0 = arith.constant 0 : index
    %c0_2 = arith.constant 0 : index
    %c0_3 = arith.constant 0 : index
    %5 = vector.load %arg3[%c0, %c0_2, %c0_3] : memref<1x256x36xbf16, #tpu.memory_space<vmem>>, vector<1x256x36xbf16>
    %6 = vector.shape_cast %5 : vector<1x256x36xbf16> to vector<256x36xbf16>
    %c0_4 = arith.constant 0 : index
    %c0_5 = arith.constant 0 : index
    %7 = vector.load %arg4[%c0_4, %c0_5] : memref<36x128xbf16, #tpu.memory_space<vmem>>, vector<36x128xbf16>
    %cst = arith.constant dense<0.000000e+00> : vector<256x128xf32>
    %8 = tpu.matmul %6, %7, %cst {dimension_numbers = #tpu.dot_dimension_numbers<[1], [0], [0], [1], [0, 0, 1, 1], [], []>} : vector<256x36xbf16>, vector<36x128xbf16>, vector<256x128xf32> -> vector<256x128xf32>
    %cst_6 = arith.constant dense<0.000000e+00> : vector<128xf32>
    %9 = vector.multi_reduction <add>, %8, %cst_6 [0] : vector<256x128xf32> to vector<128xf32>
    %10 = vector.shape_cast %9 : vector<128xf32> to vector<1x128xf32>
    %c0_7 = arith.constant 0 : index
    %c0_8 = arith.constant 0 : index
    %11 = vector.load %arg12[%c0_7, %c0_8] : memref<1x128xf32, #tpu.memory_space<vmem>>, vector<1x128xf32>
    %12 = arith.mulf %8, %8 : vector<256x128xf32>
    %cst_9 = arith.constant dense<0.000000e+00> : vector<128xf32>
    %13 = vector.multi_reduction <add>, %12, %cst_9 [0] : vector<256x128xf32> to vector<128xf32>
    %14 = vector.shape_cast %13 : vector<128xf32> to vector<1x128xf32>
    %15 = arith.addf %11, %14 : vector<1x128xf32>
    %c0_10 = arith.constant 0 : index
    %c0_11 = arith.constant 0 : index
    %16 = vector.load %arg12[%c0_10, %c0_11] : memref<1x128xf32, #tpu.memory_space<vmem>>, vector<1x128xf32>
    tpu.vector_store %arg12[%c0_10, %c0_11], %15 {strides = array<i32>} : memref<1x128xf32, #tpu.memory_space<vmem>>, vector<1x128xf32>,
    %17 = tpu.iota {dimensions = array<i32: 0>} : vector<2x1xi32>
    %c0_12 = arith.constant 0 : index
    %c0_13 = arith.constant 0 : index
    %18 = vector.load %arg11[%c0_12, %c0_13] : memref<2x128xf32, #tpu.memory_space<vmem>>, vector<2x128xf32>
    %19 = vector.broadcast %arg0 : i32 to vector<2x1xi32>
    %20 = arith.cmpi eq, %17, %19 : vector<2x1xi32>
    %21 = arith.extui %20 : vector<2x1xi1> to vector<2x1xi32>
    %22 = arith.sitofp %21 : vector<2x1xi32> to vector<2x1xf32>
    %23 = vector.broadcast %22 : vector<2x1xf32> to vector<2x128xf32>
    %24 = vector.broadcast %10 : vector<1x128xf32> to vector<2x128xf32>
    %25 = arith.mulf %23, %24 : vector<2x128xf32>
    %26 = arith.addf %18, %25 : vector<2x128xf32>
    %c0_14 = arith.constant 0 : index
    %c0_15 = arith.constant 0 : index
    %27 = vector.load %arg11[%c0_14, %c0_15] : memref<2x128xf32, #tpu.memory_space<vmem>>, vector<2x128xf32>
    tpu.vector_store %arg11[%c0_14, %c0_15], %26 {strides = array<i32>} : memref<2x128xf32, #tpu.memory_space<vmem>>, vector<2x128xf32>,
    %c1_i32 = arith.constant 1 : i32
    %28 = arith.cmpi eq, %arg0, %c1_i32 : i32
    %c0_i32_16 = arith.constant 0 : i32
    %29 = arith.cmpi eq, %arg1, %c0_i32_16 : i32
    %30 = arith.andi %28, %29 : i1
    %31 = arith.extui %30 : i1 to i32
    %c0_i32_17 = arith.constant 0 : i32
    %32 = arith.cmpi ne, %31, %c0_i32_17 : i32
    scf.if %32 {
      %c0_18 = arith.constant 0 : index
      %c0_19 = arith.constant 0 : index
      %33 = vector.load %arg11[%c0_18, %c0_19] : memref<2x128xf32, #tpu.memory_space<vmem>>, vector<2x128xf32>
      %cst_20 = arith.constant dense<0.000000e+00> : vector<128xf32>
      %34 = vector.multi_reduction <add>, %33, %cst_20 [0] : vector<2x128xf32> to vector<128xf32>
      %35 = vector.shape_cast %34 : vector<128xf32> to vector<1x128xf32>
      %cst_21 = arith.constant 5.120000e+02 : f32
      %36 = vector.broadcast %cst_21 : f32 to vector<1x128xf32>
      %37 = arith.divf %35, %36 : vector<1x128xf32>
      %c0_22 = arith.constant 0 : index
      %c0_23 = arith.constant 0 : index
      %38 = vector.load %arg12[%c0_22, %c0_23] : memref<1x128xf32, #tpu.memory_space<vmem>>, vector<1x128xf32>
      %cst_24 = arith.constant 5.120000e+02 : f32
      %39 = vector.broadcast %cst_24 : f32 to vector<1x128xf32>
      %40 = arith.divf %38, %39 : vector<1x128xf32>
      %41 = arith.mulf %37, %37 : vector<1x128xf32>
      %42 = arith.subf %40, %41 : vector<1x128xf32>
      %cst_25 = arith.constant 0.000000e+00 : f32
      %43 = vector.broadcast %cst_25 : f32 to vector<1x128xf32>
      %44 = arith.maximumf %42, %43 : vector<1x128xf32>
      %cst_26 = arith.constant 9.99999974E-6 : f32
      %45 = vector.broadcast %cst_26 : f32 to vector<1x128xf32>
      %46 = arith.addf %44, %45 : vector<1x128xf32>
      %47 = math.rsqrt %46 : vector<1x128xf32>
      %c0_27 = arith.constant 0 : index
      %c0_28 = arith.constant 0 : index
      %48 = vector.load %arg5[%c0_27, %c0_28] : memref<1x128xf32, #tpu.memory_space<vmem>>, vector<1x128xf32>
      %49 = arith.mulf %47, %48 : vector<1x128xf32>
      %cst_29 = arith.constant 3.906250e-03 : f32
      %50 = vector.broadcast %cst_29 : f32 to vector<2x128xf32>
      %51 = arith.mulf %33, %50 : vector<2x128xf32>
      %52 = vector.broadcast %37 : vector<1x128xf32> to vector<2x128xf32>
      %53 = arith.subf %51, %52 : vector<2x128xf32>
      %54 = vector.broadcast %49 : vector<1x128xf32> to vector<2x128xf32>
      %55 = arith.mulf %53, %54 : vector<2x128xf32>
      %c0_30 = arith.constant 0 : index
      %c0_31 = arith.constant 0 : index
      %56 = vector.load %arg6[%c0_30, %c0_31] : memref<1x128xf32, #tpu.memory_space<vmem>>, vector<1x128xf32>
      %57 = vector.broadcast %56 : vector<1x128xf32> to vector<2x128xf32>
      %58 = arith.addf %55, %57 : vector<2x128xf32>
      %c0_32 = arith.constant 0 : index
      %c0_33 = arith.constant 0 : index
      %c0_34 = arith.constant 0 : index
      %59 = vector.load %arg7[%c0_32, %c0_33, %c0_34] : memref<1x128x128xf32, #tpu.memory_space<vmem>>, vector<1x128x128xf32>
      %60 = vector.shape_cast %59 : vector<1x128x128xf32> to vector<128x128xf32>
      %cst_35 = arith.constant dense<0.000000e+00> : vector<2x128xf32>
      %61 = tpu.matmul %58, %60, %cst_35 {dimension_numbers = #tpu.dot_dimension_numbers<[1], [0], [0], [1], [0, 0, 1, 1], [], []>} : vector<2x128xf32>, vector<128x128xf32>, vector<2x128xf32> -> vector<2x128xf32>
      %c0_36 = arith.constant 0 : index
      %c0_37 = arith.constant 0 : index
      %c0_38 = arith.constant 0 : index
      %62 = vector.load %arg8[%c0_36, %c0_37, %c0_38] : memref<1x1x128xf32, #tpu.memory_space<vmem>>, vector<1x1x128xf32>
      %63 = vector.shape_cast %62 : vector<1x1x128xf32> to vector<1x128xf32>
      %64 = vector.broadcast %63 : vector<1x128xf32> to vector<2x128xf32>
      %65 = arith.addf %61, %64 : vector<2x128xf32>
      %c0_39 = arith.constant 0 : index
      %66 = memref.load %arg9[%c0_39] : memref<1xf32, #tpu.memory_space<smem>>
      %67 = vector.broadcast %66 : f32 to vector<2x128xf32>
      %68 = arith.mulf %67, %65 : vector<2x128xf32>
      %c0_40 = arith.constant 0 : index
      %c0_41 = arith.constant 0 : index
      %69 = vector.load %arg10[%c0_40, %c0_41] : memref<2x128xf32, #tpu.memory_space<vmem>>, vector<2x128xf32>
      tpu.vector_store %arg10[%c0_40, %c0_41], %68 {strides = array<i32>} : memref<2x128xf32, #tpu.memory_space<vmem>>, vector<2x128xf32>,
    } else {
    }
    return
  }
  func.func @transform_0(%arg0: i32, %arg1: i32, %arg2: memref<1xi32, #tpu.memory_space<smem>>) -> (i32, i32, i32) {
    %c0_i32 = arith.constant 0 : i32
    %c0_i32_0 = arith.constant 0 : i32
    return %arg0, %arg1, %c0_i32 : i32, i32, i32
  }
  func.func @transform_1(%arg0: i32, %arg1: i32, %arg2: memref<1xi32, #tpu.memory_space<smem>>) -> (i32, i32) {
    %c0_i32 = arith.constant 0 : i32
    %c0_i32_0 = arith.constant 0 : i32
    %c0_i32_1 = arith.constant 0 : i32
    return %c0_i32, %c0_i32_0 : i32, i32
  }
  func.func @transform_2(%arg0: i32, %arg1: i32, %arg2: memref<1xi32, #tpu.memory_space<smem>>) -> (i32, i32) {
    %c0_i32 = arith.constant 0 : i32
    %c0_i32_0 = arith.constant 0 : i32
    %c0_i32_1 = arith.constant 0 : i32
    return %c0_i32, %c0_i32_0 : i32, i32
  }
  func.func @transform_3(%arg0: i32, %arg1: i32, %arg2: memref<1xi32, #tpu.memory_space<smem>>) -> (i32, i32) {
    %c0_i32 = arith.constant 0 : i32
    %c0_i32_0 = arith.constant 0 : i32
    %c0_i32_1 = arith.constant 0 : i32
    return %c0_i32, %c0_i32_0 : i32, i32
  }
  func.func @transform_4(%arg0: i32, %arg1: i32, %arg2: memref<1xi32, #tpu.memory_space<smem>>) -> (i32, i32, i32) {
    %c0 = arith.constant 0 : index
    %0 = memref.load %arg2[%c0] : memref<1xi32, #tpu.memory_space<smem>>
    %c0_i32 = arith.constant 0 : i32
    %c0_i32_0 = arith.constant 0 : i32
    %c0_i32_1 = arith.constant 0 : i32
    return %0, %c0_i32, %c0_i32_0 : i32, i32, i32
  }
  func.func @transform_5(%arg0: i32, %arg1: i32, %arg2: memref<1xi32, #tpu.memory_space<smem>>) -> (i32, i32, i32) {
    %c0 = arith.constant 0 : index
    %0 = memref.load %arg2[%c0] : memref<1xi32, #tpu.memory_space<smem>>
    %c0_i32 = arith.constant 0 : i32
    %c0_i32_0 = arith.constant 0 : i32
    %c0_i32_1 = arith.constant 0 : i32
    return %0, %c0_i32, %c0_i32_0 : i32, i32, i32
  }
  func.func @transform_6(%arg0: i32, %arg1: i32, %arg2: memref<1xi32, #tpu.memory_space<smem>>) -> i32 {
    %c0_i32 = arith.constant 0 : i32
    %c0_i32_0 = arith.constant 0 : i32
    return %c0_i32 : i32
  }
  func.func @transform_7(%arg0: i32, %arg1: i32, %arg2: memref<1xi32, #tpu.memory_space<smem>>) -> (i32, i32) {
    %c0_i32 = arith.constant 0 : i32
    %c0_i32_0 = arith.constant 0 : i32
    %c0_i32_1 = arith.constant 0 : i32
    return %c0_i32, %c0_i32_0 : i32, i32
  }
}

</mosaic_0001>

<bundles_post_ra>
// kernel: tpu_custom_call.1
= control target key start
LH: loop header
LB: loop body
LE: loop exit
PB: predicated region body
PF: predicated region fallthrough
CT: control target
= control target key end

     0   :  { %s1755_s0 = inlined_call_operand.<no memory space> [shape: s32[1], index: 0, kind: input, shape index: {}]   ;;  %s1756_s1 = inlined_call_operand.vmem [shape: bf16[2,256,36], index: 1, kind: input, shape index: {}]   ;;  %s1757_s2 = inlined_call_operand.vmem [shape: bf16[36,128], index: 2, kind: input, shape index: {}]   ;;  %s1758_s3 = inlined_call_operand.vmem [shape: f32[1,128], index: 3, kind: input, shape index: {}]   ;;  %s1759_s4 = inlined_call_operand.vmem [shape: f32[1,128], index: 4, kind: input, shape index: {}]   ;;  %s1760_s5 = inlined_call_operand.hbm [shape: f32[3,128,128], index: 5, kind: input, shape index: {}]   ;;  %s1761_s6 = inlined_call_operand.vmem [shape: f32[3,1,128], index: 6, kind: input, shape index: {}]   ;;  %s1762_s7 = inlined_call_operand.<no memory space> [shape: f32[1], index: 7, kind: input, shape index: {}]   ;;  %s1763_s8 = inlined_call_operand.hbm [shape: f32[2,128], index: 8, kind: output, shape index: {}]  }
   0x1   :  { %13 = sst [smem:[#allocation5]] %s1755_s0 }
   0x2   :  { %14 = sst [smem:[#allocation6]] %s1762_s7 }
   0x3   :  { %15 = vsyncpa [#allocation8], 0 }
   0x4   :  { %16 = vsyncpa [#allocation9], 0  ;;  %s1498_s9 = smov 0   ;;  %s1500_s10 = smov 0  }
   0x5   :  { %s1502_s11 = smov 0   ;;  %s1504_s12 = smov 0  }
   0x6   :  { %s1506_s13 = smov 0  }
   0x7 LB: > { %s1043_s0 = sadd.s32 4294967295, %s1436_s13   ;;  %s34_s7 = sadd.s32 1, %s1432_s12  ;;  %s1436_s13 = sphi %s1506_s13, %s22_s13   ;;  %s1432_s12 = sphi %s1504_s12, %s1775_s12   ;;  %s1428_s11 = sphi %s1502_s11, %s1774_s11   ;;  %s1424_s10 = sphi %s1500_s10, %s1745_s10   ;;  %s1420_s9 = sphi %s1498_s9, %s1773_s9  }
   0x8   : > { %p36_p0 = scmp.ge.s32.totalorder %s34_s7, 2  ;;  %s129_s14 = sld [smem:[#allocation5]] }
   0x9   : > { %p147_p1 = scmp.ne.s32.totalorder %s1424_s10, %s1420_s9  ;;  %p148_p2 = scmp.eq.s32.totalorder %s1043_s0, 0 }
   0xa   : > { %s1777_s7 = smov (%p36_p0, %s34_s7), 0  ;;  %p1044_p3 = scmp.ge.s32.totalorder %s1436_s13, 1 }
   0xb   : > { %p228_p4 = scmp.lt.s32.totalorder %s1436_s13, 3  ;;  %p1530_p5 = por %p148_p2, %p147_p1 }
   0xc   : > { %s1438_s16 = smov [#allocation7]   ;;  %s1335_s27 = scalar_lea.hbm %s1760_s5, 6144 }
   0xd   : > { %s1767_s15 = scalar_select %p1530_p5, 1, 0 }
   0xe   : > { %s253_s17 = sshll.u32 %s1438_s16, 4  ;;  %p1534_p6 = pnand %p1044_p3, %p228_p4  ;;  %s1545_s17 = int_to_ptr.vmem [resolvable:$true] %s253_s17 }
   0xf   : > { %s1095_s19 = sshll.u32 %s129_s14, 11 }
  0x10   : > { %s1768_s18 = scalar_select %p1534_p6, 1, 0 }
  0x11   : > { %p1246_p7 = pneg %p1534_p6  ;;  %s1543_s22 = scalar_lea.hbm %s1760_s5, %s1095_s19 }
  0x12   : > { %s1330_s24 = scalar_lea.hbm %s1543_s22, 2048  ;;  %p1336_p13 = scmp.lt.u32.totalorder %s1543_s22, %s1760_s5 }
  0x13   : > { %p1549_p8 = pnand %p1246_p7, %p1530_p5  ;;  %p1331_p9 = scmp.ne.s32.totalorder %s1543_s22, %s1330_s24 }
  0x14   : > { %p1337_p0 = scmp.lt.u32.totalorder %s1335_s27, %s1330_s24  ;;  %p1339_p2 = scmp.lt.u32.totalorder %s1330_s24, %s1543_s22 }
  0x15   : > { %p1332_p10 = pneg %p1549_p8 }
  0x16   : > { %p1338_p1 = por %p1337_p0, %p1336_p13 }
  0x17   : > { %p1333_p11 = pnand %p1332_p10, %p1331_p9 }
  0x18   : > { %p1340_p3 = por %p1339_p2, %p1338_p1 }
  0x19   : > { %p1334_p12 = pneg %p1333_p11 }
  0x1b   : > { %p1341_p4 = pnand %p1340_p3, %p1334_p12 }
  0x1d   : > { %1344 = shalt.err (!%p1341_p4)
}
  0x1e   : > { %s1345_s30 = scalar_lea.vmem %s1545_s17, 2048  ;;  %p1353_p5 = scmp.lt.s32.totalorder %s1545_s17, %s1545_s17 }
  0x1f   : > { %p1346_p7 = scmp.ne.s32.totalorder %s1545_s17, %s1345_s30  ;;  %p1354_p6 = scmp.lt.s32.totalorder %s1345_s30, %s1345_s30 }
  0x21   : > { %p1348_p9 = pnand %p1346_p7, %p1332_p10  ;;  %p1355_p0 = por %p1354_p6, %p1353_p5 }
  0x23   : > { %p1349_p11 = pneg %p1348_p9 }
  0x25   : > { %p1356_p13 = pnand %p1355_p0, %p1349_p11 }
  0x27   : > { %1359 = shalt.err (!%p1356_p13)
}
  0x28   : > { %s1439_s9 = smov 128   ;;  %s1440_s14 = smov 8  }
  0x29   : > { %1249 = dma.hbm_to_vmem [thread:$0]  (!%p1549_p8), %s1543_s22, 2048, %s1545_s17, [#allocation8], %s1439_s9, %s1439_s9, %s1440_s14  }
  0x2a   : > { %p1770_p12 = scmp.ne.s32.totalorder %s1768_s18, 0 }
  0x2b   : > { %p1771_p1 = scmp.ne.s32.totalorder (!%p1770_p12), %s1767_s15, 0 }
  0x2c   : > { %293 = sbr.rel (%p1770_p12) target bundleno = 661 (0x295), region = 48 }
  0x33   : > { %1411 = dma.done.wait (%p1771_p1), [#allocation8], 2048  }
  0x34   : > { %1413 = vsyncadd (%p1771_p1), [#allocation8], 4294965248  ;;  %p329_p5 = scmp.lt.s32.totalorder %s1428_s11, 1  ;;  %p345_p6 = scmp.eq.s32.totalorder %s1428_s11, 0 }
  0x35   : > { %s339_s16 = sld [smem:[#allocation5]]  ;;  %v1441_v0 = vmov (%p345_p6), 0.0  }
  0x36   : > { %s330_s19 = scalar_select %p329_p5, %s1428_s11, 1 }
  0x37   : > { %351 = vst [vmem:[#allocation2] sm:$0x3] (%p345_p6), %v1441_v0  ;;  %352 = vst [vmem:[#allocation3] sm:$0x1] (%p345_p6), %v1441_v0 }
  0x38   : > { %s1096_s20 = sshll.u32 %s330_s19, 7  ;;  %350 = sbr.rel (!%p345_p6) target bundleno = 63 (0x3f), region = 56 }
  0x39   : > { %s1591_s17 = scalar_lea.vmem %s1756_s1, %s1096_s20 }
  0x3b   : > { %p340_p8 = scmp.lt.s32.totalorder %s339_s16, 2 }
  0x3d   : > { %s1779_s16 = smov (!%p340_p8, %s339_s16), 2 }
  0x3e   : > { %s342_s22 = scalar_lea.vmem %s1761_s6, %s1779_s16 }
  0x3f PF: > { %v1309_v1 = vld [vmem:[%s1757_s2] sm:$0xff]   ;;  %v1310_v2 = vld [vmem:[%s1757_s2 + $0x8] sm:$0xff]   ;;  %vm485_vm0 = vcmask 293888   ;;  %v1311_v3 = vld [vmem:[%s1757_s2 + $0x10] ss:$0 sps:$4 sm:$0x33]  }
  0x40   : > { %1135 = vmatprep.subr.bf16.mxu0 %v1309_v1  ;;  %v1312_v4 = vld [vmem:[%s1591_s17] sm:$0xff]   ;;  %1232 = vmatprep.subr.bf16.mxu1 %v1309_v1  ;;  %vm534_vm1 = vcmask 1041408   ;;  %v1313_v6 = vld [vmem:[%s1591_s17 + $0x8] sm:$0xff]   ;;  %v1314_v7 = vld [vmem:[%s1591_s17 + $0x10] sm:$0xff]   ;;  %p818_p10 = scmp.eq.s32.totalorder %s1428_s11, 1 }
  0x41   : > { %1136 = vmatpush3.bf16.msra.mxu0 %v1309_v1  ;;  %1235 = vmatpush3.bf16.msra.mxu1 %v1309_v1  ;;  %v536_v5 = vsel %vm534_vm1, %v1311_v3, 0  ;;  %v1320_v8 = vld [vmem:[%s1591_s17 + $0x40] sm:$0xff]   ;;  %v1321_v9 = vld [vmem:[%s1591_s17 + $0x48] sm:$0xff]   ;;  %v1322_v10 = vld [vmem:[%s1591_s17 + $0x50] sm:$0xff]   ;;  %vm1444_vm3 = vmmov (%p818_p10), 0   ;;  %s952_s19 = sld [smem:[#allocation6]] (%p818_p10) }
  0x42   : > { %1137 = vmatprep.subr.bf16.mxu0 %v1310_v2  ;;  %1141 = vmatprep.mubr.msk.bf16.mxu0 %vm485_vm0, %v1312_v4  ;;  %v1315_v11 = vld [vmem:[%s1591_s17 + $0x18] sm:$0xff]   ;;  %v1316_v13 = vld [vmem:[%s1591_s17 + $0x20] sm:$0xff]   ;;  %v1317_v15 = vld [vmem:[%s1591_s17 + $0x28] sm:$0xff]  }
  0x43   : > { %1233 = vmatprep.subr.bf16.mxu1 %v1310_v2  ;;  %1157 = vmatprep.mubr.msk.bf16.mxu1 %vm485_vm0, %v1320_v8  ;;  %v1323_v12 = vld [vmem:[%s1591_s17 + $0x58] sm:$0xff]   ;;  %v1324_v14 = vld [vmem:[%s1591_s17 + $0x60] sm:$0xff]   ;;  %v1325_v16 = vld [vmem:[%s1591_s17 + $0x68] sm:$0xff]  }
  0x44   : > { %v1318_v17 = vld [vmem:[%s1591_s17 + $0x30] sm:$0xff]   ;;  %v1319_v19 = vld [vmem:[%s1591_s17 + $0x38] sm:$0xff]  }
  0x45   : > { %1138 = vmatpush3.bf16.msra.mxu0 %v1310_v2  ;;  %1236 = vmatpush3.bf16.msra.mxu1 %v1310_v2  ;;  %v1326_v18 = vld [vmem:[%s1591_s17 + $0x70] sm:$0xff]   ;;  %v1327_v20 = vld [vmem:[%s1591_s17 + $0x78] sm:$0xff]  }
  0x46   : > { %1238 = vmatprep.subr.msk.bf16.mxu0 %vm534_vm1, %v1311_v3  ;;  %1239 = vmatprep.subr.msk.bf16.mxu1 %vm534_vm1, %v1311_v3 }
  0x49   : > { %1140 = vmatpush3.bf16.msra.mxu0 %v536_v5  ;;  %1237 = vmatpush3.bf16.msra.mxu1 %v536_v5 }
  0x4c   : > { %1142 = vmatmul.mubr.msk.bf16.vlgmr.msra.gmra.mrb[0].mxu0 %vm485_vm0, %v1313_v6  ;;  %1158 = vmatmul.mubr.msk.bf16.vlgmr.msra.gmra.mrb[0].mxu1 %vm485_vm0, %v1321_v9 }
  0x4d   : > { %1145 = vmatprep.mubr.msk.bf16.mxu0 %vm485_vm0, %v1314_v7  ;;  %1161 = vmatprep.mubr.msk.bf16.mxu1 %vm485_vm0, %v1322_v10 }
  0x54   : > { %1146 = vmatmul.mubr.msk.bf16.gmra.mrb[4].mxu0 %vm485_vm0, %v1315_v11  ;;  %1162 = vmatmul.mubr.msk.bf16.gmra.mrb[4].mxu1 %vm485_vm0, %v1323_v12 }
  0x55   : > { %1149 = vmatprep.mubr.msk.bf16.mxu0 %vm485_vm0, %v1316_v13  ;;  %1165 = vmatprep.mubr.msk.bf16.mxu1 %vm485_vm0, %v1324_v14 }
  0x5c   : > { %1150 = vmatmul.mubr.msk.bf16.gmra.mrb[8].mxu0 %vm485_vm0, %v1317_v15  ;;  %1166 = vmatmul.mubr.msk.bf16.gmra.mrb[8].mxu1 %vm485_vm0, %v1325_v16 }
  0x5d   : > { %1153 = vmatprep.mubr.msk.bf16.mxu0 %vm485_vm0, %v1318_v17  ;;  %1169 = vmatprep.mubr.msk.bf16.mxu1 %vm485_vm0, %v1326_v18 }
  0x64   : > { %1154 = vmatmul.mubr.msk.bf16.gmra.mrb[12].mxu0 %vm485_vm0, %v1319_v19  ;;  %1170 = vmatmul.mubr.msk.bf16.gmra.mrb[12].mxu1 %vm485_vm0, %v1327_v20 }
 0x11f   : > { %v1143_v21 = vpop.f32.mrb[0].mxu0  ;;  %v1644_v22 = vpop.f32.mrb[0].mxu1 }
 0x120   : > { %v572_v23 = vpop.f32.mrb[1].mxu0  ;;  %v1646_v24 = vpop.f32.mrb[1].mxu1  ;;  %v739_v32 = vmul.f32 %v1143_v21, %v1143_v21 }
 0x121   : > { %v1144_v25 = vpop.f32.mrb[2].mxu0  ;;  %v1648_v26 = vpop.f32.mrb[2].mxu1  ;;  %v737_v29 = vmul.f32 %v572_v23, %v572_v23 }
 0x122   : > { %v575_v27 = vpop.f32.mrb[3].mxu0  ;;  %v1650_v28 = vpop.f32.mrb[3].mxu1  ;;  %v740_v35 = vmul.f32 %v1144_v25, %v1144_v25 }
 0x123   : > { %v699_v30 = vadd.f32 %v575_v27, %v572_v23  ;;  %v738_v31 = vmul.f32 %v575_v27, %v575_v27 }
 0x125   : > { %v700_v33 = vadd.f32 %v1143_v21, %v699_v30  ;;  %v769_v34 = vadd.f32 %v738_v31, %v737_v29 }
 0x127   : > { %v770_v36 = vadd.f32 %v769_v34, %v739_v32  ;;  %v1147_v37 = vpop.f32.mrb[4].mxu0  ;;  %v701_v38 = vadd.f32 %v1144_v25, %v700_v33  ;;  %v1652_v39 = vpop.f32.mrb[4].mxu1 }
 0x128   : > { %v588_v40 = vpop.f32.mrb[5].mxu0  ;;  %v1654_v41 = vpop.f32.mrb[5].mxu1  ;;  %v743_v52 = vmul.f32 %v1147_v37, %v1147_v37 }
 0x129   : > { %v702_v42 = vadd.f32 %v701_v38, %v588_v40  ;;  %v741_v43 = vmul.f32 %v588_v40, %v588_v40  ;;  %v771_v44 = vadd.f32 %v770_v36, %v740_v35  ;;  %v1148_v45 = vpop.f32.mrb[6].mxu0  ;;  %v1656_v46 = vpop.f32.mrb[6].mxu1  ;;  %v753_v38 = vmul.f32 %v1646_v24, %v1646_v24 }
 0x12a   : > { %v591_v47 = vpop.f32.mrb[7].mxu0  ;;  %v1658_v48 = vpop.f32.mrb[7].mxu1  ;;  %v744_v55 = vmul.f32 %v1148_v45, %v1148_v45 }
 0x12b   : > { %v772_v49 = vadd.f32 %v771_v44, %v741_v43  ;;  %v703_v50 = vadd.f32 %v702_v42, %v591_v47  ;;  %v742_v51 = vmul.f32 %v591_v47, %v591_v47  ;;  %v755_v47 = vmul.f32 %v1644_v22, %v1644_v22 }
 0x12d   : > { %v704_v53 = vadd.f32 %v1147_v37, %v703_v50  ;;  %v773_v54 = vadd.f32 %v772_v49, %v742_v51  ;;  %v756_v51 = vmul.f32 %v1648_v26, %v1648_v26 }
 0x12f   : > { %v774_v56 = vadd.f32 %v773_v54, %v743_v52  ;;  %v1151_v57 = vpop.f32.mrb[8].mxu0  ;;  %v705_v58 = vadd.f32 %v1148_v45, %v704_v53  ;;  %v1660_v59 = vpop.f32.mrb[8].mxu1  ;;  %v754_v45 = vmul.f32 %v1650_v28, %v1650_v28 }
 0x130   : > { %v604_v60 = vpop.f32.mrb[9].mxu0  ;;  %v668_v61 = vpop.f32.mrb[9].mxu1  ;;  %v747_v8 = vmul.f32 %v1151_v57, %v1151_v57 }
 0x131   : > { %v706_v62 = vadd.f32 %v705_v58, %v604_v60  ;;  %v745_v63 = vmul.f32 %v604_v60, %v604_v60  ;;  %v775_v0 = vadd.f32 %v774_v56, %v744_v55  ;;  %v1152_v1 = vpop.f32.mrb[10].mxu0  ;;  %v1662_v2 = vpop.f32.mrb[10].mxu1 }
 0x132   : > { %v607_v3 = vpop.f32.mrb[11].mxu0  ;;  %v671_v4 = vpop.f32.mrb[11].mxu1  ;;  %v748_v11 = vmul.f32 %v1152_v1, %v1152_v1 }
 0x133   : > { %v776_v5 = vadd.f32 %v775_v0, %v745_v63  ;;  %v707_v6 = vadd.f32 %v706_v62, %v607_v3  ;;  %v746_v7 = vmul.f32 %v607_v3, %v607_v3 }
 0x135   : > { %v708_v9 = vadd.f32 %v1151_v57, %v707_v6  ;;  %v777_v10 = vadd.f32 %v776_v5, %v746_v7  ;;  %v758_v57 = vmul.f32 %v1658_v48, %v1658_v48  ;;  %v762_v6 = vmul.f32 %v671_v4, %v671_v4 }
 0x137   : > { %v778_v12 = vadd.f32 %v777_v10, %v747_v8  ;;  %v1155_v13 = vpop.f32.mrb[12].mxu0  ;;  %v709_v14 = vadd.f32 %v1152_v1, %v708_v9  ;;  %v1171_v15 = vpop.f32.mrb[12].mxu1 }
 0x138   : > { %v620_v16 = vpop.f32.mrb[13].mxu0  ;;  %v684_v17 = vpop.f32.mrb[13].mxu1  ;;  %v751_v32 = vmul.f32 %v1155_v13, %v1155_v13 }
 0x139   : > { %v710_v18 = vadd.f32 %v709_v14, %v620_v16  ;;  %v749_v19 = vmul.f32 %v620_v16, %v620_v16  ;;  %v779_v20 = vadd.f32 %v778_v12, %v748_v11  ;;  %v1156_v21 = vpop.f32.mrb[14].mxu0  ;;  %v1172_v23 = vpop.f32.mrb[14].mxu1  ;;  %v765_v11 = vmul.f32 %v684_v17, %v684_v17 }
 0x13a   : > { %v623_v25 = vpop.f32.mrb[15].mxu0  ;;  %v687_v27 = vpop.f32.mrb[15].mxu1  ;;  %v752_v35 = vmul.f32 %v1156_v21, %v1156_v21 }
 0x13b   : > { %v780_v29 = vadd.f32 %v779_v20, %v749_v19  ;;  %v711_v30 = vadd.f32 %v710_v18, %v623_v25  ;;  %v750_v31 = vmul.f32 %v623_v25, %v623_v25  ;;  %v766_v14 = vmul.f32 %v687_v27, %v687_v27 }
 0x13c   : > { %v768_v19 = vmul.f32 %v1172_v23, %v1172_v23 }
 0x13d   : > { %v712_v33 = vadd.f32 %v1155_v13, %v711_v30  ;;  %v781_v34 = vadd.f32 %v780_v29, %v750_v31 }
 0x13f   : > { %v782_v36 = vadd.f32 %v781_v34, %v751_v32  ;;  %v713_v37 = vadd.f32 %v1156_v21, %v712_v33  ;;  %v808_v21 = vlaneseq }
 0x141   : > { %v714_v40 = vadd.f32 %v713_v37, %v1646_v24  ;;  %v783_v42 = vadd.f32 %v782_v36, %v752_v35  ;;  %v757_v24 = vmul.f32 %v1654_v41, %v1654_v41  ;;  %v1694_v32 = vshrl.u32 %v808_v21, 7 }
 0x142   : > { %v1442_v36 = vmov 0.0  }
 0x143   : > { %v784_v43 = vadd.f32 %v783_v42, %v753_v38  ;;  %v715_v44 = vadd.f32 %v714_v40, %v1650_v28  ;;  %v736_v40 = vld [vmem:[#allocation3] sm:$0x1]  ;;  %v810_v42 = vld [vmem:[#allocation2] sm:$0x3] }
 0x145   : > { %v716_v49 = vadd.f32 %v1644_v22, %v715_v44  ;;  %v785_v50 = vadd.f32 %v784_v43, %v754_v45  ;;  %v759_v22 = vmul.f32 %v1652_v39, %v1652_v39 }
 0x147   : > { %v786_v52 = vadd.f32 %v785_v50, %v755_v47  ;;  %v717_v53 = vadd.f32 %v1648_v26, %v716_v49  ;;  %v760_v26 = vmul.f32 %v1656_v46, %v1656_v46  ;;  %v859_v49 = vld [vmem:[#allocation7] sm:$0xff] (%p818_p10)  ;;  %v860_v50 = vld [vmem:[#allocation7 + $0x8] sm:$0xff] (%p818_p10) }
 0x149   : > { %v718_v54 = vadd.f32 %v717_v53, %v1654_v41  ;;  %v787_v55 = vadd.f32 %v786_v52, %v756_v51  ;;  %v761_v41 = vmul.f32 %v668_v61, %v668_v61  ;;  %v861_v51 = vld [vmem:[#allocation7 + $0x10] sm:$0xff] (%p818_p10)  ;;  %v1443_v52 = vmov (%p818_p10), 0.0|0.0  }
 0x14a   : > { %1208 = vmatprep.subr.bf16.mxu0 (%p818_p10), %v1443_v52  ;;  %v1209_v53 = vpack.c.bf16 (%p818_p10), %v860_v50, %v859_v49 }
 0x14b   : > { %v788_v56 = vadd.f32 %v787_v55, %v757_v24  ;;  %v719_v28 = vadd.f32 %v718_v54, %v1658_v48  ;;  %v763_v48 = vmul.f32 %v1660_v59, %v1660_v59  ;;  %v862_v24 = vld [vmem:[#allocation7 + $0x18] sm:$0xff] (%p818_p10)  ;;  %v1445_v54 = vmov (%p818_p10), 0.0  }
 0x14c   : > { %1205 = vmatprep.mubr.msk.f32.mxu0 (%p818_p10), %vm1444_vm3, %v1445_v54  ;;  %1210 = vmatpush3.bf16.msra.mxu0 (%p818_p10), %v1209_v53  ;;  %v1212_v55 = vpack.c.bf16 (%p818_p10), %v862_v24, %v861_v51 }
 0x14d   : > { %v720_v58 = vadd.f32 %v1652_v39, %v719_v28  ;;  %v789_v60 = vadd.f32 %v788_v56, %v758_v57  ;;  %v764_v39 = vmul.f32 %v1662_v2, %v1662_v2  ;;  %1211 = vmatprep.subr.bf16.mxu0 (%p818_p10), %v1443_v52  ;;  %v863_v56 = vld [vmem:[#allocation7 + $0x20] sm:$0xff] (%p818_p10)  ;;  %v864_v28 = vld [vmem:[#allocation7 + $0x28] sm:$0xff] (%p818_p10) }
 0x14f   : > { %v790_v62 = vadd.f32 %v789_v60, %v759_v22  ;;  %v721_v63 = vadd.f32 %v1656_v46, %v720_v58  ;;  %v1215_v58 = vpack.c.bf16 (%p818_p10), %v864_v28, %v863_v56 }
 0x150   : > { %1213 = vmatpush3.bf16.msra.mxu0 (%p818_p10), %v1212_v55 }
 0x151   : > { %v722_v0 = vadd.f32 %v721_v63, %v668_v61  ;;  %v791_v1 = vadd.f32 %v790_v62, %v760_v26  ;;  %1214 = vmatprep.subr.bf16.mxu0 (%p818_p10), %v1443_v52  ;;  %v865_v26 = vld [vmem:[#allocation7 + $0x30] sm:$0xff] (%p818_p10)  ;;  %v866_v62 = vld [vmem:[#allocation7 + $0x38] sm:$0xff] (%p818_p10) }
 0x153   : > { %v792_v3 = vadd.f32 %v791_v1, %v761_v41  ;;  %v723_v5 = vadd.f32 %v722_v0, %v671_v4  ;;  %v767_v4 = vmul.f32 %v1171_v15, %v1171_v15  ;;  %v1218_v41 = vpack.c.bf16 (%p818_p10), %v866_v62, %v865_v26  ;;  %v867_v1 = vld [vmem:[#allocation7 + $0x40] sm:$0xff] (%p818_p10) }
 0x154   : > { %1216 = vmatpush3.bf16.msra.mxu0 (%p818_p10), %v1215_v58 }
 0x155   : > { %v724_v7 = vadd.f32 %v1660_v59, %v723_v5  ;;  %v793_v8 = vadd.f32 %v792_v3, %v762_v6  ;;  %1217 = vmatprep.subr.bf16.mxu0 (%p818_p10), %v1443_v52  ;;  %v868_v3 = vld [vmem:[#allocation7 + $0x48] sm:$0xff] (%p818_p10) }
 0x156   : > { %v1221_v6 = vpack.c.bf16 (%p818_p10), %v868_v3, %v867_v1 }
 0x157   : > { %v794_v9 = vadd.f32 %v793_v8, %v763_v48  ;;  %v725_v10 = vadd.f32 %v1662_v2, %v724_v7  ;;  %v811_v2 = vstv %s1428_s11  ;;  %v869_v7 = vld [vmem:[#allocation7 + $0x50] sm:$0xff] (%p818_p10)  ;;  %v870_v8 = vld [vmem:[#allocation7 + $0x58] sm:$0xff] (%p818_p10) }
 0x158   : > { %vm812_vm2 = vcmp.eq.s32.totalorder %v1694_v32, %v811_v2  ;;  %1219 = vmatpush3.bf16.msra.mxu0 (%p818_p10), %v1218_v41 }
 0x159   : > { %v726_v46 = vadd.f32 %v725_v10, %v684_v17  ;;  %v795_v12 = vadd.f32 %v794_v9, %v764_v39  ;;  %v1087_v37 = vsel %vm812_vm2, 1.0, %v1442_v36  ;;  %1220 = vmatprep.subr.bf16.mxu0 (%p818_p10), %v1443_v52  ;;  %v1224_v10 = vpack.c.bf16 (%p818_p10), %v870_v8, %v869_v7 }
 0x15a   : > { %v953_v36 = vstv (%p818_p10), %s952_s19 }
 0x15b   : > { %v796_v61 = vadd.f32 %v795_v12, %v765_v11  ;;  %v727_v13 = vadd.f32 %v726_v46, %v687_v27  ;;  %v871_v12 = vld [vmem:[#allocation7 + $0x60] sm:$0xff] (%p818_p10) }
 0x15c   : > { %1222 = vmatpush3.bf16.msra.mxu0 (%p818_p10), %v1221_v6 }
 0x15d   : > { %v728_v16 = vadd.f32 %v1171_v15, %v727_v13  ;;  %v797_v18 = vadd.f32 %v796_v61, %v766_v14  ;;  %1223 = vmatprep.subr.bf16.mxu0 (%p818_p10), %v1443_v52  ;;  %v872_v61 = vld [vmem:[#allocation7 + $0x68] sm:$0xff] (%p818_p10) }
 0x15e   : > { %v1227_v14 = vpack.c.bf16 (%p818_p10), %v872_v61, %v871_v12 }
 0x15f   : > { %v729_v20 = vadd.f32 %v1172_v23, %v728_v16  ;;  %v798_v59 = vadd.f32 %v797_v18, %v767_v4  ;;  %v873_v16 = vld [vmem:[#allocation7 + $0x70] sm:$0xff] (%p818_p10)  ;;  %v874_v18 = vld [vmem:[#allocation7 + $0x78] sm:$0xff] (%p818_p10) }
 0x160   : > { %1225 = vmatpush3.bf16.msra.mxu0 (%p818_p10), %v1224_v10 }
 0x161   : > { %v730_v25 = vrot.slane %v729_v20, 4  ;;  %v799_v29 = vadd.f32 %v798_v59, %v768_v19  ;;  %1226 = vmatprep.subr.bf16.mxu0 (%p818_p10), %v1443_v52 }
 0x163   : > { %v731_v30 = vadd.f32 %v730_v25, %v729_v20  ;;  %v800_v31 = vrot.slane %v799_v29, 4  ;;  %v1230_v20 = vpack.c.bf16 (%p818_p10), %v874_v18, %v873_v16  ;;  %v840_v25 = vld [vmem:[%s1758_s3] sm:$0x1] (%p818_p10) }
 0x164   : > { %1228 = vmatpush3.bf16.msra.mxu0 (%p818_p10), %v1227_v14 }
 0x165   : > { %v732_v17 = vrot.slane %v731_v30, 2  ;;  %v801_v33 = vadd.f32 %v800_v31, %v799_v29  ;;  %1229 = vmatprep.subr.bf16.mxu0 (%p818_p10), %v1443_v52  ;;  %v847_v29 = vsub.s32 (%p818_p10), 0, %v1694_v32 }
 0x167   : > { %v733_v34 = vadd.f32 %v732_v17, %v731_v30  ;;  %v802_v35 = vrot.slane %v801_v33, 2 }
 0x168   : > { %1231 = vmatpush3.bf16.msra.mxu0 (%p818_p10), %v1230_v20 }
 0x169   : > { %v734_v27 = vrot.slane %v733_v34, 1  ;;  %v803_v15 = vadd.f32 %v802_v35, %v801_v33  ;;  %v1089_v33 = vld [vmem:[%s1759_s4] ss:$0 sm:$0xff] (%p818_p10) }
 0x16b   : > { %v735_v23 = vadd.f32 %v734_v27, %v733_v34  ;;  %v804_v38 = vrot.slane %v803_v15, 1  ;;  %822 = sbr.rel (!%p818_p10) target bundleno = 636 (0x27c), region = 60  ;;  %v1090_v27 = vld [vmem:[%s342_s22] ss:$0 sm:$0xff] (%p818_p10) }
 0x16d   : > { %v805_v43 = vadd.f32 %v804_v38, %v803_v15  ;;  %v815_v44 = vmul.f32 %v1087_v37, %v735_v23 }
 0x16f   : > { %v806_v45 = vadd.f32 %v805_v43, %v736_v40  ;;  %v816_v47 = vadd.f32 %v815_v44, %v810_v42 }
 0x171   : > { %807 = vst [vmem:[#allocation3] sm:$0x1] %v806_v45  ;;  %817 = vst [vmem:[#allocation2] sm:$0x3] %v816_v47 }
 0x178   : > { %v823_v57 = vld [vmem:[#allocation2] sm:$0x3]  ;;  %v833_v39 = vld [vmem:[#allocation3] sm:$0x1] }
 0x179   : > { %v824_v22 = vsel %vm534_vm1, %v823_v57, 0.0  ;;  %v834_v46 = vmul.f32 0.001953125, %v833_v39  ;;  %v842_v21 = vmul.f32 0.00390625, %v823_v57 }
 0x17a   : > { %v825_v60 = vrot.slane %v824_v22, 4 }
 0x17c   : > { %v826_v63 = vadd.f32 %v825_v60, %v824_v22 }
 0x17e   : > { %v827_v0 = vrot.slane %v826_v63, 2 }
 0x180   : > { %v828_v5 = vadd.f32 %v827_v0, %v826_v63 }
 0x182   : > { %v829_v48 = vrot.slane %v828_v5, 1 }
 0x184   : > { %v830_v9 = vadd.f32 %v829_v48, %v828_v5 }
 0x186   : > { %v832_v11 = vmul.f32 0.001953125, %v830_v9 }
 0x188   : > { %v835_v13 = vmul.f32 %v832_v11, %v832_v11  ;;  %v843_v2 = vsub.f32 %v842_v21, %v832_v11 }
 0x18a   : > { %v836_v4 = vsub.f32 %v834_v46, %v835_v13 }
 0x18c   : > { %v837_v19 = vmax.f32 %v836_v4, 0.0 }
 0x18e   : > { %v838_v59 = vadd.f32 1e-05, %v837_v19 }
 0x190   : > { %1328 = vrsqrt.f32 %v838_v59 }
 0x19a   : > { %v1329_v30 = vpop.eup %1328 }
 0x19b   : > { %v841_v31 = vmul.f32 %v1329_v30, %v840_v25 }
 0x19d   : > { %v848_v17 = vrot.slane %v841_v31, %v847_v29 }
 0x19f   : > { %v850_v34 = vmul.f32 %v848_v17, %v843_v2 }
 0x1a1   : > { %v858_v35 = vadd.f32 %v1089_v33, %v850_v34 }
 0x1a3   : > { %1206 = vmatmul.mubr.f32.vlgmr.msra.gmra.mrb[0].mxu0 %v858_v35 }
 0x276   : > { %v948_v15 = vpop.f32.mrb[0].mxu0 }
 0x277   : > { %v949_v32 = vadd.f32 %v1090_v27, %v948_v15  ;;  %v1207_v37 = vpop.f32.mrb[1].mxu0 }
 0x279   : > { %v954_v23 = vmul.f32 %v953_v36, %v949_v32 }
 0x27b   : > { %955 = vst [vmem:[#allocation10] sm:$0x3] %v954_v23 }
 0x27c PF: > { %p1715_p2 = scmp.eq.s32.totalorder %s1043_s0, 1  ;;  %s1446_s17 = smov [#allocation10]  }
 0x27d   : > { %s963_s18 = sshll.u32 %s1446_s17, 4  ;;  %s964_s18 = int_to_ptr.vmem [resolvable:$true] %s963_s18 }
 0x27e   : > { %s1360_s15 = scalar_lea.vmem %s964_s18, 32  ;;  %p1367_p9 = scmp.lt.s32.totalorder %s964_s18, %s964_s18 }
 0x27f   : > { %p1361_p3 = scmp.ne.s32.totalorder %s964_s18, %s1360_s15  ;;  %p1368_p11 = scmp.lt.s32.totalorder %s1360_s15, %s1360_s15 }
 0x281   : > { %p1362_p4 = pnand %p1361_p3, %p1715_p2  ;;  %p1369_p0 = por %p1368_p11, %p1367_p9 }
 0x283   : > { %p1363_p7 = pneg %p1362_p4 }
 0x285   : > { %p1370_p13 = pnand %p1369_p0, %p1363_p7 }
 0x287   : > { %1373 = shalt.err (!%p1370_p13)
}
 0x288   : > { %s1374_s0 = scalar_lea.hbm %s1763_s8, 32 }
 0x289   : > { %p1375_p12 = scmp.ne.s32.totalorder %s1763_s8, %s1374_s0  ;;  %p1380_p6 = scmp.lt.u32.totalorder %s1374_s0, %s1763_s8 }
 0x28b   : > { %p1376_p1 = pnand %p1375_p12, %p1715_p2 }
 0x28d   : > { %p1377_p5 = pneg %p1376_p1 }
 0x28f   : > { %p1382_p8 = pnand %p1380_p6, %p1377_p5 }
 0x291   : > { %1385 = shalt.err (!%p1382_p8)
}
 0x292   : > { %1243 = dma.vmem_to_hbm [thread:$0]  (%p1715_p2), %s964_s18, 32, %s1763_s8, [#allocation9]  }
 0x293   : > { %1415 = dma.done.wait (%p1715_p2), [#allocation9], 32  }
 0x294   : > { %1417 = vsyncadd (%p1715_p2), [#allocation9], 4294967264 }
 0x295 PF: > { %s22_s13 = sadd.s32 1, %s1436_s13   ;;  %s1773_s9 = smov %s1424_s10 }
 0x296   : > { %p19_p10 = scmp.ge.s32.totalorder %s22_s13, 4   ;;  %s1745_s10 = smov 0  }
 0x297   : > { %s1774_s11 = smov %s1432_s12  ;;  %s1775_s12 = smov %s1777_s7 }
 0x298   :  { %21 = sbr.rel (!%p19_p10) target bundleno = 7 (0x7), region = 92 }
 0x29f   :  { %976 = vsyncpa [#allocation8], 1 }
 0x2a0   :  { %978 = vsyncpa [#allocation8 + $0x1], 1 }
 0x2a1   :  { %979 = vsyncpa [#allocation9], 1 }
 0x2a2   :  { %981 = vsyncpa [#allocation9 + $0x1], 1 }

</bundles_post_ra>
